<compile_context>
chip_gen: v6e
topology: v6e:2x2x1
jax: 0.10.0
libtpu: 0.0.40
codegen_flags: <defaults>
</compile_context>

<pallas_src>
import functools

import jax
import jax.numpy as jnp
from jax.experimental import pallas as pl
from jax.experimental.pallas import tpu as pltpu

_HALO = 8  # rows per halo edge block (minimum sublane-aligned block)


def _conv_layer_kernel(x_ref, prev_ref, next_ref, res_ref, mask_ref,
                       w_ref, bias_ref, gamma_ref, beta_ref, out_ref, *, eps):
    # x_ref/res_ref/out_ref: [TS, H]; prev_ref/next_ref: [8, H];
    # mask_ref: [TS, 1]; w_ref: [3H, H]; bias/gamma/beta: [1, H].
    ts = x_ref.shape[0]
    s_idx = pl.program_id(1)
    n_seq = pl.num_programs(1)
    mm_dtype = w_ref.dtype

    x = x_ref[...].astype(mm_dtype)                               # [TS, H]

    # Halo rows from neighbouring tiles; zeroed at the true sequence ends
    # (conv zero padding).
    prev_row = jnp.where(s_idx > 0,
                         prev_ref[_HALO - 1:_HALO, :], 0).astype(mm_dtype)
    next_row = jnp.where(s_idx < n_seq - 1,
                         next_ref[0:1, :], 0).astype(mm_dtype)

    # Sequence +/-1 shifts in-register (XLU roll, non-negative shifts only);
    # only the single wrapped row is patched with the halo row.
    row_ids = jax.lax.broadcasted_iota(jnp.int32, (ts, 1), 0)
    x_prev = jnp.where(row_ids == 0, prev_row,
                       pltpu.roll(x, shift=1, axis=0))
    x_next = jnp.where(row_ids == ts - 1, next_row,
                       pltpu.roll(x, shift=ts - 1, axis=0))

    # Fused k=3 conv: one MXU contraction [TS,3H] @ [3H,H], f32 accumulation.
    x3 = jnp.concatenate([x_prev, x, x_next], axis=-1)
    conv = jnp.dot(x3, w_ref[...], preferred_element_type=jnp.float32)
    conv = conv + bias_ref[...]

    mask = mask_ref[...]                                          # [TS, 1] f32
    conv = conv * mask                                            # masked_fill(rmask, 0)
    act = jnp.tanh(conv)                                          # StableDropout = id (eval)

    # Residual add + LayerNorm over hidden dim; single-pass stats, f32 math.
    ln_in = res_ref[...].astype(jnp.float32) + act
    mean = jnp.mean(ln_in, axis=-1, keepdims=True)
    mean_sq = jnp.mean(ln_in * ln_in, axis=-1, keepdims=True)
    var = mean_sq - mean * mean
    normed = (ln_in - mean) * jax.lax.rsqrt(var + jnp.float32(eps))
    out = normed * gamma_ref[...] + beta_ref[...]

    # Final output masking (input_mask path of the module).
    out_ref[...] = (out * mask).astype(out_ref.dtype)


def _pick_seq_tile(seq_len):
    """Largest MXU-friendly sequence tile that divides S (prefer >=256)."""
    for ts in (512, 256, 128, 64, 32, 16, 8):
        if seq_len % ts == 0:
            return ts
    return seq_len


def _vmem_limit_bytes():
    """~85% of this generation's VMEM capacity (headroom for Mosaic scratch)."""
    cap = 64 << 20
    try:
        info = pltpu.get_tpu_info()
        cap = int(getattr(info, "vmem_capacity_bytes", cap))
    except Exception:
        pass  # no TPU visible (e.g. interpret mode) -> conservative default
    return int(cap * 0.85)


def deberta_conv_layer(hidden_states, residual_states, input_mask,
                       conv_weight, conv_bias, gamma, beta, *,
                       eps=1e-7, matmul_dtype=None, seq_tile=None):
    """hidden/residual: [B,S,H]; input_mask: [B,S]; conv_weight: [H_out,H_in,3]."""
    B, S, H = hidden_states.shape
    K = conv_weight.shape[-1]
    assert K == 3, "kernel written for conv_kernel_size=3 (DeBERTa-v2 default)"
    assert residual_states.shape == (B, S, H)
    assert S % _HALO == 0, "sequence length must be a multiple of 8"

    if input_mask.ndim == 4:                      # [B,1,1,S] attention-style mask
        input_mask = input_mask[:, 0, 0, :]
    assert input_mask.shape == (B, S)

    ts = seq_tile if seq_tile is not None else _pick_seq_tile(S)
    assert S % ts == 0 and ts % _HALO == 0
    n_seq = S // ts
    blocks_per_tile = ts // _HALO
    n_halo_blocks = S // _HALO

    # Per-tap weights stacked for one right-hand contraction:
    #   [W0^T ; W1^T ; W2^T] : [3H_in, H_out]  (tap k multiplies x[s + k - 1]).
    w_dtype = matmul_dtype if matmul_dtype is not None else conv_weight.dtype
    w3 = jnp.concatenate(
        [jnp.transpose(conv_weight[:, :, k]) for k in range(3)], axis=0
    ).astype(w_dtype)

    bias2 = conv_bias.astype(jnp.float32).reshape(1, H)
    g2 = gamma.astype(jnp.float32).reshape(1, H)
    be2 = beta.astype(jnp.float32).reshape(1, H)
    mask3 = input_mask.astype(jnp.float32).reshape(B, S, 1)

    a_bytes = jnp.dtype(hidden_states.dtype).itemsize
    w_bytes = jnp.dtype(w_dtype).itemsize
    cost = pl.CostEstimate(
        flops=int(2 * B * S * 3 * H * H + 12 * B * S * H),
        transcendentals=int(B * S * H + B * S),            # tanh + rsqrt
        bytes_accessed=int((3 * B * S * H + 2 * B * n_seq * _HALO * H) * a_bytes
                           + B * S * 4 + 3 * H * H * w_bytes + 3 * H * 4),
    )

    kernel = functools.partial(_conv_layer_kernel, eps=eps)

    tile_map = lambda b, s: (b, s, 0)
    prev_map = lambda b, s: (b, jnp.maximum(s * blocks_per_tile - 1, 0), 0)
    next_map = lambda b, s: (b, jnp.minimum((s + 1) * blocks_per_tile,
                                            n_halo_blocks - 1), 0)

    def build_in_specs(single_buffer_invariants):
        def const_spec(shape):
            if single_buffer_invariants:
                return pl.BlockSpec(shape, lambda b, s: (0, 0),
                                    pipeline_mode=pl.Buffered(1))
            return pl.BlockSpec(shape, lambda b, s: (0, 0))
        return [
            pl.BlockSpec((None, ts, H), tile_map),        # hidden tile
            pl.BlockSpec((None, _HALO, H), prev_map),     # prev-tile halo rows
            pl.BlockSpec((None, _HALO, H), next_map),     # next-tile halo rows
            pl.BlockSpec((None, ts, H), tile_map),        # residual tile
            pl.BlockSpec((None, ts, 1), tile_map),        # mask tile
            const_spec((3 * H, H)),                       # stacked conv taps
            const_spec((1, H)),                           # conv bias
            const_spec((1, H)),                           # LN gamma
            const_spec((1, H)),                           # LN beta
        ]

    def run(single_buffer_invariants):
        return pl.pallas_call(
            kernel,
            out_shape=jax.ShapeDtypeStruct((B, S, H), hidden_states.dtype),
            grid_spec=pltpu.PrefetchScalarGridSpec(
                num_scalar_prefetch=0,
                grid=(B, n_seq),
                in_specs=build_in_specs(single_buffer_invariants),
                out_specs=pl.BlockSpec((None, ts, H), tile_map),
            ),
            compiler_params=pltpu.CompilerParams(
                dimension_semantics=("parallel", "parallel"),
                vmem_limit_bytes=_vmem_limit_bytes()),
            cost_estimate=cost,
        )(hidden_states, hidden_states, hidden_states, residual_states, mask3,
          w3, bias2, g2, be2)

    try:
        return run(True)
    except Exception:
        # pipeline_mode=pl.Buffered(1) not supported on this jax/Mosaic version:
        # fall back to default double-buffered invariants (correct, more VMEM).
        return run(False)


def _reference(hidden, residual, mask, weight, bias, gamma, beta, eps):
    """Pure-JAX mirror of ConvLayer.forward (eval mode)."""
    B, S, H = hidden.shape
    K = weight.shape[-1]
    pad = (K - 1) // 2
    xp = jnp.pad(hidden.astype(jnp.float32), ((0, 0), (pad, pad), (0, 0)))
    out = jnp.zeros((B, S, H), jnp.float32)
    for k in range(K):
        out = out + jnp.einsum("bsi,oi->bso", xp[:, k:k + S, :],
                               weight[:, :, k].astype(jnp.float32))
    out = out + bias
    out = out * mask[..., None]
    out = jnp.tanh(out)
    ln_in = residual.astype(jnp.float32) + out
    mu = ln_in.mean(-1, keepdims=True)
    var = ((ln_in - mu) ** 2).mean(-1, keepdims=True)
    normed = (ln_in - mu) / jnp.sqrt(var + eps) * gamma + beta
    return normed * mask[..., None]


if __name__ == "__main__":
    eps = 1e-7  # DeBERTa-v2 layer_norm_eps default
    key = jax.random.PRNGKey(0)

    # ---- Test 1/2: small single-tile config (batch=2, seq=8, hidden=32) ----
    batch, seq, hidden = 2, 8, 32
    kh, kr, kw, kb, k2 = jax.random.split(key, 5)
    hidden_states = jax.random.normal(kh, (batch, seq, hidden), dtype=jnp.float32)
    residual_states = jax.random.normal(kr, (batch, seq, hidden), dtype=jnp.float32)
    conv_weight = jax.random.normal(kw, (hidden, hidden, 3), dtype=jnp.float32) * 0.05
    conv_bias = jax.random.normal(kb, (hidden,), dtype=jnp.float32) * 0.01
    gamma = jnp.ones((hidden,), dtype=jnp.float32)
    beta = jnp.zeros((hidden,), dtype=jnp.float32)
    input_mask = jnp.ones((batch, seq), dtype=jnp.int32).at[1, -2:].set(0)

    ref = _reference(hidden_states, residual_states, input_mask.astype(jnp.float32),
                     conv_weight, conv_bias, gamma, beta, eps)

    out = deberta_conv_layer(hidden_states, residual_states, input_mask,
                             conv_weight, conv_bias, gamma, beta, eps=eps)
    out = jax.block_until_ready(out)
    assert out.shape == (batch, seq, hidden)
    assert jnp.allclose(out, ref, atol=1e-3, rtol=1e-3), "f32 path mismatch"

    out_bf16 = deberta_conv_layer(hidden_states, residual_states, input_mask,
                                  conv_weight, conv_bias, gamma, beta, eps=eps,
                                  matmul_dtype=jnp.bfloat16)
    out_bf16 = jax.block_until_ready(out_bf16)
    assert jnp.allclose(out_bf16, ref, atol=3e-2, rtol=3e-2), "bf16 path mismatch"

    # ---- Test 3: two sequence tiles (seq=16, seq_tile=8) exercises halos ----
    seq2 = 16
    k2h, k2r, _ = jax.random.split(k2, 3)
    hidden2 = jax.random.normal(k2h, (batch, seq2, hidden), dtype=jnp.float32)
    residual2 = jax.random.normal(k2r, (batch, seq2, hidden), dtype=jnp.float32)
    mask2 = jnp.ones((batch, seq2), dtype=jnp.int32).at[0, -3:].set(0)

    ref2 = _reference(hidden2, residual2, mask2.astype(jnp.float32),
                      conv_weight, conv_bias, gamma, beta, eps)
    out2 = deberta_conv_layer(hidden2, residual2, mask2,
                              conv_weight, conv_bias, gamma, beta,
                              eps=eps, seq_tile=8)
    out2 = jax.block_until_ready(out2)
    assert jnp.allclose(out2, ref2, atol=1e-3, rtol=1e-3), "tiled halo mismatch"

    print("KERNEL_OK")
</pallas_src>

<mosaic_0001>
module attributes {stable_mosaic.version = 11 : i64} {
  func.func @_conv_layer_kernel(%arg0: i32, %arg1: i32, %arg2: memref<1x8x32xf32, #tpu.memory_space<vmem>>, %arg3: memref<1x8x32xf32, #tpu.memory_space<vmem>>, %arg4: memref<1x8x32xf32, #tpu.memory_space<vmem>>, %arg5: memref<1x8x32xf32, #tpu.memory_space<vmem>>, %arg6: memref<1x8x1xf32, #tpu.memory_space<vmem>>, %arg7: memref<96x32xf32, #tpu.memory_space<vmem>>, %arg8: memref<1x32xf32, #tpu.memory_space<vmem>>, %arg9: memref<1x32xf32, #tpu.memory_space<vmem>>, %arg10: memref<1x32xf32, #tpu.memory_space<vmem>>, %arg11: memref<1x8x32xf32, #tpu.memory_space<vmem>>) attributes {dimension_semantics = [#tpu.dimension_semantics<parallel>, #tpu.dimension_semantics<parallel>], iteration_bounds = array<i64: 2, 1>, scalar_prefetch = 0 : i64, scratch_operands = 0 : i64, tpu.core_type = #tpu.core_type<tc>, window_params = [{transform_indices = @transform_0, window_bounds = array<i64: 1, 8, 32>}, {transform_indices = @transform_1, window_bounds = array<i64: 1, 8, 32>}, {transform_indices = @transform_2, window_bounds = array<i64: 1, 8, 32>}, {transform_indices = @transform_3, window_bounds = array<i64: 1, 8, 32>}, {transform_indices = @transform_4, window_bounds = array<i64: 1, 8, 1>}, {pipeline_mode = #tpu.pipeline_mode<synchronous>, transform_indices = @transform_5, window_bounds = array<i64: 96, 32>}, {pipeline_mode = #tpu.pipeline_mode<synchronous>, transform_indices = @transform_6, window_bounds = array<i64: 1, 32>}, {pipeline_mode = #tpu.pipeline_mode<synchronous>, transform_indices = @transform_7, window_bounds = array<i64: 1, 32>}, {pipeline_mode = #tpu.pipeline_mode<synchronous>, transform_indices = @transform_8, window_bounds = array<i64: 1, 32>}, {transform_indices = @transform_9, window_bounds = array<i64: 1, 8, 32>}]} {
    %c0 = arith.constant 0 : index
    %c0_0 = arith.constant 0 : index
    %c0_1 = arith.constant 0 : index
    %0 = vector.load %arg2[%c0, %c0_0, %c0_1] : memref<1x8x32xf32, #tpu.memory_space<vmem>>, vector<1x8x32xf32>
    %1 = vector.shape_cast %0 : vector<1x8x32xf32> to vector<8x32xf32>
    %c0_i32 = arith.constant 0 : i32
    %2 = arith.cmpi sgt, %arg1, %c0_i32 : i32
    %c0_2 = arith.constant 0 : index
    %c7 = arith.constant 7 : index
    %c0_3 = arith.constant 0 : index
    %3 = vector.load %arg3[%c0_2, %c7, %c0_3] : memref<1x8x32xf32, #tpu.memory_space<vmem>>, vector<1x1x32xf32>
    %4 = vector.shape_cast %3 : vector<1x1x32xf32> to vector<1x32xf32>
    %c0_i32_4 = arith.constant 0 : i32
    %5 = arith.sitofp %c0_i32_4 : i32 to f32
    %6 = vector.broadcast %5 : f32 to vector<1x32xf32>
    %7 = arith.select %2, %4, %6 : vector<1x32xf32>
    %c0_i32_5 = arith.constant 0 : i32
    %8 = arith.cmpi slt, %arg1, %c0_i32_5 : i32
    %c0_6 = arith.constant 0 : index
    %c0_7 = arith.constant 0 : index
    %c0_8 = arith.constant 0 : index
    %9 = vector.load %arg4[%c0_6, %c0_7, %c0_8] : memref<1x8x32xf32, #tpu.memory_space<vmem>>, vector<1x1x32xf32>
    %10 = vector.shape_cast %9 : vector<1x1x32xf32> to vector<1x32xf32>
    %c0_i32_9 = arith.constant 0 : i32
    %11 = arith.sitofp %c0_i32_9 : i32 to f32
    %12 = vector.broadcast %11 : f32 to vector<1x32xf32>
    %13 = arith.select %8, %10, %12 : vector<1x32xf32>
    %14 = tpu.iota {dimensions = array<i32: 0>} : vector<8x1xi32>
    %c0_i32_10 = arith.constant 0 : i32
    %15 = vector.broadcast %c0_i32_10 : i32 to vector<8x1xi32>
    %16 = arith.cmpi eq, %14, %15 : vector<8x1xi32>
    %c1_i32 = arith.constant 1 : i32
    %17 = tpu.dynamic_rotate %1 by %c1_i32 dim 0 : vector<8x32xf32>, i32 -> vector<8x32xf32>
    %18 = vector.shape_cast %16 : vector<8x1xi1> to vector<8x1xi1>
    %19 = vector.broadcast %18 : vector<8x1xi1> to vector<8x32xi1>
    %20 = vector.shape_cast %7 : vector<1x32xf32> to vector<1x32xf32>
    %21 = vector.broadcast %20 : vector<1x32xf32> to vector<8x32xf32>
    %22 = arith.select %19, %21, %17 : vector<8x32xi1>, vector<8x32xf32>
    %c7_i32 = arith.constant 7 : i32
    %23 = vector.broadcast %c7_i32 : i32 to vector<8x1xi32>
    %24 = arith.cmpi eq, %14, %23 : vector<8x1xi32>
    %c7_i32_11 = arith.constant 7 : i32
    %25 = tpu.dynamic_rotate %1 by %c7_i32_11 dim 0 : vector<8x32xf32>, i32 -> vector<8x32xf32>
    %26 = vector.shape_cast %24 : vector<8x1xi1> to vector<8x1xi1>
    %27 = vector.broadcast %26 : vector<8x1xi1> to vector<8x32xi1>
    %28 = vector.shape_cast %13 : vector<1x32xf32> to vector<1x32xf32>
    %29 = vector.broadcast %28 : vector<1x32xf32> to vector<8x32xf32>
    %30 = arith.select %27, %29, %25 : vector<8x32xi1>, vector<8x32xf32>
    %31 = tpu.concatenate %22, %1, %30 in 1 : vector<8x32xf32>, vector<8x32xf32>, vector<8x32xf32> -> vector<8x96xf32>
    %c0_12 = arith.constant 0 : index
    %c0_13 = arith.constant 0 : index
    %32 = vector.load %arg7[%c0_12, %c0_13] : memref<96x32xf32, #tpu.memory_space<vmem>>, vector<96x32xf32>
    %cst = arith.constant dense<0.000000e+00> : vector<8x32xf32>
    %33 = tpu.matmul %31, %32, %cst {dimension_numbers = #tpu.dot_dimension_numbers<[1], [0], [0], [1], [0, 0, 1, 1], [], []>} : vector<8x96xf32>, vector<96x32xf32>, vector<8x32xf32> -> vector<8x32xf32>
    %c0_14 = arith.constant 0 : index
    %c0_15 = arith.constant 0 : index
    %34 = vector.load %arg8[%c0_14, %c0_15] : memref<1x32xf32, #tpu.memory_space<vmem>>, vector<1x32xf32>
    %35 = vector.broadcast %34 : vector<1x32xf32> to vector<8x32xf32>
    %36 = arith.addf %33, %35 : vector<8x32xf32>
    %c0_16 = arith.constant 0 : index
    %c0_17 = arith.constant 0 : index
    %c0_18 = arith.constant 0 : index
    %37 = vector.load %arg6[%c0_16, %c0_17, %c0_18] : memref<1x8x1xf32, #tpu.memory_space<vmem>>, vector<1x8x1xf32>
    %38 = vector.shape_cast %37 : vector<1x8x1xf32> to vector<8x1xf32>
    %39 = vector.broadcast %38 : vector<8x1xf32> to vector<8x32xf32>
    %40 = arith.mulf %36, %39 : vector<8x32xf32>
    %41 = math.tanh %40 : vector<8x32xf32>
    %c0_19 = arith.constant 0 : index
    %c0_20 = arith.constant 0 : index
    %c0_21 = arith.constant 0 : index
    %42 = vector.load %arg5[%c0_19, %c0_20, %c0_21] : memref<1x8x32xf32, #tpu.memory_space<vmem>>, vector<1x8x32xf32>
    %43 = vector.shape_cast %42 : vector<1x8x32xf32> to vector<8x32xf32>
    %44 = arith.addf %43, %41 : vector<8x32xf32>
    %cst_22 = arith.constant dense<0.000000e+00> : vector<8xf32>
    %45 = vector.multi_reduction <add>, %44, %cst_22 [1] : vector<8x32xf32> to vector<8xf32>
    %46 = vector.shape_cast %45 : vector<8xf32> to vector<8x1xf32>
    %cst_23 = arith.constant 3.200000e+01 : f32
    %47 = vector.broadcast %cst_23 : f32 to vector<8x1xf32>
    %48 = arith.divf %46, %47 : vector<8x1xf32>
    %49 = arith.mulf %44, %44 : vector<8x32xf32>
    %cst_24 = arith.constant dense<0.000000e+00> : vector<8xf32>
    %50 = vector.multi_reduction <add>, %49, %cst_24 [1] : vector<8x32xf32> to vector<8xf32>
    %51 = vector.shape_cast %50 : vector<8xf32> to vector<8x1xf32>
    %cst_25 = arith.constant 3.200000e+01 : f32
    %52 = vector.broadcast %cst_25 : f32 to vector<8x1xf32>
    %53 = arith.divf %51, %52 : vector<8x1xf32>
    %54 = arith.mulf %48, %48 : vector<8x1xf32>
    %55 = arith.subf %53, %54 : vector<8x1xf32>
    %56 = vector.broadcast %48 : vector<8x1xf32> to vector<8x32xf32>
    %57 = arith.subf %44, %56 : vector<8x32xf32>
    %cst_26 = arith.constant 1.000000e-07 : f32
    %58 = vector.broadcast %cst_26 : f32 to vector<8x1xf32>
    %59 = arith.addf %55, %58 : vector<8x1xf32>
    %60 = math.rsqrt %59 : vector<8x1xf32>
    %61 = vector.broadcast %60 : vector<8x1xf32> to vector<8x32xf32>
    %62 = arith.mulf %57, %61 : vector<8x32xf32>
    %c0_27 = arith.constant 0 : index
    %c0_28 = arith.constant 0 : index
    %63 = vector.load %arg9[%c0_27, %c0_28] : memref<1x32xf32, #tpu.memory_space<vmem>>, vector<1x32xf32>
    %64 = vector.broadcast %63 : vector<1x32xf32> to vector<8x32xf32>
    %65 = arith.mulf %62, %64 : vector<8x32xf32>
    %c0_29 = arith.constant 0 : index
    %c0_30 = arith.constant 0 : index
    %66 = vector.load %arg10[%c0_29, %c0_30] : memref<1x32xf32, #tpu.memory_space<vmem>>, vector<1x32xf32>
    %67 = vector.broadcast %66 : vector<1x32xf32> to vector<8x32xf32>
    %68 = arith.addf %65, %67 : vector<8x32xf32>
    %69 = vector.broadcast %38 : vector<8x1xf32> to vector<8x32xf32>
    %70 = arith.mulf %68, %69 : vector<8x32xf32>
    %c0_31 = arith.constant 0 : index
    %c0_32 = arith.constant 0 : index
    %c0_33 = arith.constant 0 : index
    %71 = vector.load %arg11[%c0_31, %c0_32, %c0_33] : memref<1x8x32xf32, #tpu.memory_space<vmem>>, vector<1x8x32xf32>
    %72 = vector.shape_cast %71 : vector<1x8x32xf32> to vector<8x32xf32>
    %73 = vector.shape_cast %70 : vector<8x32xf32> to vector<1x8x32xf32>
    tpu.vector_store %arg11[%c0_31, %c0_32, %c0_33], %73 {strides = array<i32>} : memref<1x8x32xf32, #tpu.memory_space<vmem>>, vector<1x8x32xf32>,
    return
  }
  func.func @transform_0(%arg0: i32, %arg1: i32) -> (i32, i32, i32) {
    %c0_i32 = arith.constant 0 : i32
    %c0_i32_0 = arith.constant 0 : i32
    return %arg0, %arg1, %c0_i32 : i32, i32, i32
  }
  func.func @transform_1(%arg0: i32, %arg1: i32) -> (i32, i32, i32) {
    %c1_i32 = arith.constant 1 : i32
    %0 = arith.muli %arg1, %c1_i32 : i32
    %c1_i32_0 = arith.constant 1 : i32
    %1 = arith.subi %0, %c1_i32_0 : i32
    %c0_i32 = arith.constant 0 : i32
    %2 = arith.maxsi %1, %c0_i32 : i32
    %c0_i32_1 = arith.constant 0 : i32
    %c0_i32_2 = arith.constant 0 : i32
    return %arg0, %2, %c0_i32_1 : i32, i32, i32
  }
  func.func @transform_2(%arg0: i32, %arg1: i32) -> (i32, i32, i32) {
    %c1_i32 = arith.constant 1 : i32
    %0 = arith.addi %arg1, %c1_i32 : i32
    %c1_i32_0 = arith.constant 1 : i32
    %1 = arith.muli %0, %c1_i32_0 : i32
    %c0_i32 = arith.constant 0 : i32
    %2 = arith.minsi %1, %c0_i32 : i32
    %c0_i32_1 = arith.constant 0 : i32
    %c0_i32_2 = arith.constant 0 : i32
    return %arg0, %2, %c0_i32_1 : i32, i32, i32
  }
  func.func @transform_3(%arg0: i32, %arg1: i32) -> (i32, i32, i32) {
    %c0_i32 = arith.constant 0 : i32
    %c0_i32_0 = arith.constant 0 : i32
    return %arg0, %arg1, %c0_i32 : i32, i32, i32
  }
  func.func @transform_4(%arg0: i32, %arg1: i32) -> (i32, i32, i32) {
    %c0_i32 = arith.constant 0 : i32
    %c0_i32_0 = arith.constant 0 : i32
    return %arg0, %arg1, %c0_i32 : i32, i32, i32
  }
  func.func @transform_5(%arg0: i32, %arg1: i32) -> (i32, i32) {
    %c0_i32 = arith.constant 0 : i32
    %c0_i32_0 = arith.constant 0 : i32
    %c0_i32_1 = arith.constant 0 : i32
    return %c0_i32, %c0_i32_0 : i32, i32
  }
  func.func @transform_6(%arg0: i32, %arg1: i32) -> (i32, i32) {
    %c0_i32 = arith.constant 0 : i32
    %c0_i32_0 = arith.constant 0 : i32
    %c0_i32_1 = arith.constant 0 : i32
    return %c0_i32, %c0_i32_0 : i32, i32
  }
  func.func @transform_7(%arg0: i32, %arg1: i32) -> (i32, i32) {
    %c0_i32 = arith.constant 0 : i32
    %c0_i32_0 = arith.constant 0 : i32
    %c0_i32_1 = arith.constant 0 : i32
    return %c0_i32, %c0_i32_0 : i32, i32
  }
  func.func @transform_8(%arg0: i32, %arg1: i32) -> (i32, i32) {
    %c0_i32 = arith.constant 0 : i32
    %c0_i32_0 = arith.constant 0 : i32
    %c0_i32_1 = arith.constant 0 : i32
    return %c0_i32, %c0_i32_0 : i32, i32
  }
  func.func @transform_9(%arg0: i32, %arg1: i32) -> (i32, i32, i32) {
    %c0_i32 = arith.constant 0 : i32
    %c0_i32_0 = arith.constant 0 : i32
    return %arg0, %arg1, %c0_i32 : i32, i32, i32
  }
}

module attributes {stable_mosaic.version = 11 : i64} {
  func.func @_conv_layer_kernel(%arg0: i32, %arg1: i32, %arg2: memref<1x8x32xf32, #tpu.memory_space<vmem>>, %arg3: memref<1x8x32xf32, #tpu.memory_space<vmem>>, %arg4: memref<1x8x32xf32, #tpu.memory_space<vmem>>, %arg5: memref<1x8x32xf32, #tpu.memory_space<vmem>>, %arg6: memref<1x8x1xf32, #tpu.memory_space<vmem>>, %arg7: memref<96x32xf32, #tpu.memory_space<vmem>>, %arg8: memref<1x32xf32, #tpu.memory_space<vmem>>, %arg9: memref<1x32xf32, #tpu.memory_space<vmem>>, %arg10: memref<1x32xf32, #tpu.memory_space<vmem>>, %arg11: memref<1x8x32xf32, #tpu.memory_space<vmem>>) attributes {dimension_semantics = [#tpu.dimension_semantics<parallel>, #tpu.dimension_semantics<parallel>], iteration_bounds = array<i64: 2, 1>, scalar_prefetch = 0 : i64, scratch_operands = 0 : i64, tpu.core_type = #tpu.core_type<tc>, window_params = [{transform_indices = @transform_0, window_bounds = array<i64: 1, 8, 32>}, {transform_indices = @transform_1, window_bounds = array<i64: 1, 8, 32>}, {transform_indices = @transform_2, window_bounds = array<i64: 1, 8, 32>}, {transform_indices = @transform_3, window_bounds = array<i64: 1, 8, 32>}, {transform_indices = @transform_4, window_bounds = array<i64: 1, 8, 1>}, {pipeline_mode = #tpu.pipeline_mode<synchronous>, transform_indices = @transform_5, window_bounds = array<i64: 96, 32>}, {pipeline_mode = #tpu.pipeline_mode<synchronous>, transform_indices = @transform_6, window_bounds = array<i64: 1, 32>}, {pipeline_mode = #tpu.pipeline_mode<synchronous>, transform_indices = @transform_7, window_bounds = array<i64: 1, 32>}, {pipeline_mode = #tpu.pipeline_mode<synchronous>, transform_indices = @transform_8, window_bounds = array<i64: 1, 32>}, {transform_indices = @transform_9, window_bounds = array<i64: 1, 8, 32>}]} {
    %c0 = arith.constant 0 : index
    %c0_0 = arith.constant 0 : index
    %c0_1 = arith.constant 0 : index
    %0 = vector.load %arg2[%c0, %c0_0, %c0_1] : memref<1x8x32xf32, #tpu.memory_space<vmem>>, vector<1x8x32xf32>
    %1 = vector.shape_cast %0 : vector<1x8x32xf32> to vector<8x32xf32>
    %c0_i32 = arith.constant 0 : i32
    %2 = arith.cmpi sgt, %arg1, %c0_i32 : i32
    %c0_2 = arith.constant 0 : index
    %c7 = arith.constant 7 : index
    %c0_3 = arith.constant 0 : index
    %3 = vector.load %arg3[%c0_2, %c7, %c0_3] : memref<1x8x32xf32, #tpu.memory_space<vmem>>, vector<1x1x32xf32>
    %4 = vector.shape_cast %3 : vector<1x1x32xf32> to vector<1x32xf32>
    %c0_i32_4 = arith.constant 0 : i32
    %5 = arith.sitofp %c0_i32_4 : i32 to f32
    %6 = vector.broadcast %5 : f32 to vector<1x32xf32>
    %7 = arith.select %2, %4, %6 : vector<1x32xf32>
    %c0_i32_5 = arith.constant 0 : i32
    %8 = arith.cmpi slt, %arg1, %c0_i32_5 : i32
    %c0_6 = arith.constant 0 : index
    %c0_7 = arith.constant 0 : index
    %c0_8 = arith.constant 0 : index
    %9 = vector.load %arg4[%c0_6, %c0_7, %c0_8] : memref<1x8x32xf32, #tpu.memory_space<vmem>>, vector<1x1x32xf32>
    %10 = vector.shape_cast %9 : vector<1x1x32xf32> to vector<1x32xf32>
    %c0_i32_9 = arith.constant 0 : i32
    %11 = arith.sitofp %c0_i32_9 : i32 to f32
    %12 = vector.broadcast %11 : f32 to vector<1x32xf32>
    %13 = arith.select %8, %10, %12 : vector<1x32xf32>
    %14 = tpu.iota {dimensions = array<i32: 0>} : vector<8x1xi32>
    %c0_i32_10 = arith.constant 0 : i32
    %15 = vector.broadcast %c0_i32_10 : i32 to vector<8x1xi32>
    %16 = arith.cmpi eq, %14, %15 : vector<8x1xi32>
    %c1_i32 = arith.constant 1 : i32
    %17 = tpu.dynamic_rotate %1 by %c1_i32 dim 0 : vector<8x32xf32>, i32 -> vector<8x32xf32>
    %18 = vector.shape_cast %16 : vector<8x1xi1> to vector<8x1xi1>
    %19 = vector.broadcast %18 : vector<8x1xi1> to vector<8x32xi1>
    %20 = vector.shape_cast %7 : vector<1x32xf32> to vector<1x32xf32>
    %21 = vector.broadcast %20 : vector<1x32xf32> to vector<8x32xf32>
    %22 = arith.select %19, %21, %17 : vector<8x32xi1>, vector<8x32xf32>
    %c7_i32 = arith.constant 7 : i32
    %23 = vector.broadcast %c7_i32 : i32 to vector<8x1xi32>
    %24 = arith.cmpi eq, %14, %23 : vector<8x1xi32>
    %c7_i32_11 = arith.constant 7 : i32
    %25 = tpu.dynamic_rotate %1 by %c7_i32_11 dim 0 : vector<8x32xf32>, i32 -> vector<8x32xf32>
    %26 = vector.shape_cast %24 : vector<8x1xi1> to vector<8x1xi1>
    %27 = vector.broadcast %26 : vector<8x1xi1> to vector<8x32xi1>
    %28 = vector.shape_cast %13 : vector<1x32xf32> to vector<1x32xf32>
    %29 = vector.broadcast %28 : vector<1x32xf32> to vector<8x32xf32>
    %30 = arith.select %27, %29, %25 : vector<8x32xi1>, vector<8x32xf32>
    %31 = tpu.concatenate %22, %1, %30 in 1 : vector<8x32xf32>, vector<8x32xf32>, vector<8x32xf32> -> vector<8x96xf32>
    %c0_12 = arith.constant 0 : index
    %c0_13 = arith.constant 0 : index
    %32 = vector.load %arg7[%c0_12, %c0_13] : memref<96x32xf32, #tpu.memory_space<vmem>>, vector<96x32xf32>
    %cst = arith.constant dense<0.000000e+00> : vector<8x32xf32>
    %33 = tpu.matmul %31, %32, %cst {dimension_numbers = #tpu.dot_dimension_numbers<[1], [0], [0], [1], [0, 0, 1, 1], [], []>} : vector<8x96xf32>, vector<96x32xf32>, vector<8x32xf32> -> vector<8x32xf32>
    %c0_14 = arith.constant 0 : index
    %c0_15 = arith.constant 0 : index
    %34 = vector.load %arg8[%c0_14, %c0_15] : memref<1x32xf32, #tpu.memory_space<vmem>>, vector<1x32xf32>
    %35 = vector.broadcast %34 : vector<1x32xf32> to vector<8x32xf32>
    %36 = arith.addf %33, %35 : vector<8x32xf32>
    %c0_16 = arith.constant 0 : index
    %c0_17 = arith.constant 0 : index
    %c0_18 = arith.constant 0 : index
    %37 = vector.load %arg6[%c0_16, %c0_17, %c0_18] : memref<1x8x1xf32, #tpu.memory_space<vmem>>, vector<1x8x1xf32>
    %38 = vector.shape_cast %37 : vector<1x8x1xf32> to vector<8x1xf32>
    %39 = vector.broadcast %38 : vector<8x1xf32> to vector<8x32xf32>
    %40 = arith.mulf %36, %39 : vector<8x32xf32>
    %41 = math.tanh %40 : vector<8x32xf32>
    %c0_19 = arith.constant 0 : index
    %c0_20 = arith.constant 0 : index
    %c0_21 = arith.constant 0 : index
    %42 = vector.load %arg5[%c0_19, %c0_20, %c0_21] : memref<1x8x32xf32, #tpu.memory_space<vmem>>, vector<1x8x32xf32>
    %43 = vector.shape_cast %42 : vector<1x8x32xf32> to vector<8x32xf32>
    %44 = arith.addf %43, %41 : vector<8x32xf32>
    %cst_22 = arith.constant dense<0.000000e+00> : vector<8xf32>
    %45 = vector.multi_reduction <add>, %44, %cst_22 [1] : vector<8x32xf32> to vector<8xf32>
    %46 = vector.shape_cast %45 : vector<8xf32> to vector<8x1xf32>
    %cst_23 = arith.constant 3.200000e+01 : f32
    %47 = vector.broadcast %cst_23 : f32 to vector<8x1xf32>
    %48 = arith.divf %46, %47 : vector<8x1xf32>
    %49 = arith.mulf %44, %44 : vector<8x32xf32>
    %cst_24 = arith.constant dense<0.000000e+00> : vector<8xf32>
    %50 = vector.multi_reduction <add>, %49, %cst_24 [1] : vector<8x32xf32> to vector<8xf32>
    %51 = vector.shape_cast %50 : vector<8xf32> to vector<8x1xf32>
    %cst_25 = arith.constant 3.200000e+01 : f32
    %52 = vector.broadcast %cst_25 : f32 to vector<8x1xf32>
    %53 = arith.divf %51, %52 : vector<8x1xf32>
    %54 = arith.mulf %48, %48 : vector<8x1xf32>
    %55 = arith.subf %53, %54 : vector<8x1xf32>
    %56 = vector.broadcast %48 : vector<8x1xf32> to vector<8x32xf32>
    %57 = arith.subf %44, %56 : vector<8x32xf32>
    %cst_26 = arith.constant 1.000000e-07 : f32
    %58 = vector.broadcast %cst_26 : f32 to vector<8x1xf32>
    %59 = arith.addf %55, %58 : vector<8x1xf32>
    %60 = math.rsqrt %59 : vector<8x1xf32>
    %61 = vector.broadcast %60 : vector<8x1xf32> to vector<8x32xf32>
    %62 = arith.mulf %57, %61 : vector<8x32xf32>
    %c0_27 = arith.constant 0 : index
    %c0_28 = arith.constant 0 : index
    %63 = vector.load %arg9[%c0_27, %c0_28] : memref<1x32xf32, #tpu.memory_space<vmem>>, vector<1x32xf32>
    %64 = vector.broadcast %63 : vector<1x32xf32> to vector<8x32xf32>
    %65 = arith.mulf %62, %64 : vector<8x32xf32>
    %c0_29 = arith.constant 0 : index
    %c0_30 = arith.constant 0 : index
    %66 = vector.load %arg10[%c0_29, %c0_30] : memref<1x32xf32, #tpu.memory_space<vmem>>, vector<1x32xf32>
    %67 = vector.broadcast %66 : vector<1x32xf32> to vector<8x32xf32>
    %68 = arith.addf %65, %67 : vector<8x32xf32>
    %69 = vector.broadcast %38 : vector<8x1xf32> to vector<8x32xf32>
    %70 = arith.mulf %68, %69 : vector<8x32xf32>
    %c0_31 = arith.constant 0 : index
    %c0_32 = arith.constant 0 : index
    %c0_33 = arith.constant 0 : index
    %71 = vector.load %arg11[%c0_31, %c0_32, %c0_33] : memref<1x8x32xf32, #tpu.memory_space<vmem>>, vector<1x8x32xf32>
    %72 = vector.shape_cast %71 : vector<1x8x32xf32> to vector<8x32xf32>
    %73 = vector.shape_cast %70 : vector<8x32xf32> to vector<1x8x32xf32>
    tpu.vector_store %arg11[%c0_31, %c0_32, %c0_33], %73 {strides = array<i32>} : memref<1x8x32xf32, #tpu.memory_space<vmem>>, vector<1x8x32xf32>,
    return
  }
  func.func @transform_0(%arg0: i32, %arg1: i32) -> (i32, i32, i32) {
    %c0_i32 = arith.constant 0 : i32
    %c0_i32_0 = arith.constant 0 : i32
    return %arg0, %arg1, %c0_i32 : i32, i32, i32
  }
  func.func @transform_1(%arg0: i32, %arg1: i32) -> (i32, i32, i32) {
    %c1_i32 = arith.constant 1 : i32
    %0 = arith.muli %arg1, %c1_i32 : i32
    %c1_i32_0 = arith.constant 1 : i32
    %1 = arith.subi %0, %c1_i32_0 : i32
    %c0_i32 = arith.constant 0 : i32
    %2 = arith.maxsi %1, %c0_i32 : i32
    %c0_i32_1 = arith.constant 0 : i32
    %c0_i32_2 = arith.constant 0 : i32
    return %arg0, %2, %c0_i32_1 : i32, i32, i32
  }
  func.func @transform_2(%arg0: i32, %arg1: i32) -> (i32, i32, i32) {
    %c1_i32 = arith.constant 1 : i32
    %0 = arith.addi %arg1, %c1_i32 : i32
    %c1_i32_0 = arith.constant 1 : i32
    %1 = arith.muli %0, %c1_i32_0 : i32
    %c0_i32 = arith.constant 0 : i32
    %2 = arith.minsi %1, %c0_i32 : i32
    %c0_i32_1 = arith.constant 0 : i32
    %c0_i32_2 = arith.constant 0 : i32
    return %arg0, %2, %c0_i32_1 : i32, i32, i32
  }
  func.func @transform_3(%arg0: i32, %arg1: i32) -> (i32, i32, i32) {
    %c0_i32 = arith.constant 0 : i32
    %c0_i32_0 = arith.constant 0 : i32
    return %arg0, %arg1, %c0_i32 : i32, i32, i32
  }
  func.func @transform_4(%arg0: i32, %arg1: i32) -> (i32, i32, i32) {
    %c0_i32 = arith.constant 0 : i32
    %c0_i32_0 = arith.constant 0 : i32
    return %arg0, %arg1, %c0_i32 : i32, i32, i32
  }
  func.func @transform_5(%arg0: i32, %arg1: i32) -> (i32, i32) {
    %c0_i32 = arith.constant 0 : i32
    %c0_i32_0 = arith.constant 0 : i32
    %c0_i32_1 = arith.constant 0 : i32
    return %c0_i32, %c0_i32_0 : i32, i32
  }
  func.func @transform_6(%arg0: i32, %arg1: i32) -> (i32, i32) {
    %c0_i32 = arith.constant 0 : i32
    %c0_i32_0 = arith.constant 0 : i32
    %c0_i32_1 = arith.constant 0 : i32
    return %c0_i32, %c0_i32_0 : i32, i32
  }
  func.func @transform_7(%arg0: i32, %arg1: i32) -> (i32, i32) {
    %c0_i32 = arith.constant 0 : i32
    %c0_i32_0 = arith.constant 0 : i32
    %c0_i32_1 = arith.constant 0 : i32
    return %c0_i32, %c0_i32_0 : i32, i32
  }
  func.func @transform_8(%arg0: i32, %arg1: i32) -> (i32, i32) {
    %c0_i32 = arith.constant 0 : i32
    %c0_i32_0 = arith.constant 0 : i32
    %c0_i32_1 = arith.constant 0 : i32
    return %c0_i32, %c0_i32_0 : i32, i32
  }
  func.func @transform_9(%arg0: i32, %arg1: i32) -> (i32, i32, i32) {
    %c0_i32 = arith.constant 0 : i32
    %c0_i32_0 = arith.constant 0 : i32
    return %arg0, %arg1, %c0_i32 : i32, i32, i32
  }
}

</mosaic_0001>

<bundles_post_ra>
// kernel: tpu_custom_call.1
= control target key start
LH: loop header
LB: loop body
LE: loop exit
PB: predicated region body
PF: predicated region fallthrough
CT: control target
= control target key end

     0   :  { %14 = vsyncpa [#allocation3], 0  ;;  %s1253_s0 = inlined_call_operand.vmem [shape: f32[2,8,32], index: 0, kind: input, shape index: {}]   ;;  %s1254_s1 = inlined_call_operand.vmem [shape: f32[2,8,32], index: 1, kind: input, shape index: {}]   ;;  %s1255_s2 = inlined_call_operand.vmem [shape: f32[2,8,32], index: 2, kind: input, shape index: {}]   ;;  %s1256_s3 = inlined_call_operand.vmem [shape: f32[2,8,32], index: 3, kind: input, shape index: {}]   ;;  %s1257_s4 = inlined_call_operand.vmem [shape: f32[2,8,1], index: 4, kind: input, shape index: {}]   ;;  %s1258_s5 = inlined_call_operand.vmem [shape: f32[96,32], index: 5, kind: input, shape index: {}]   ;;  %s1259_s6 = inlined_call_operand.vmem [shape: f32[1,32], index: 6, kind: input, shape index: {}]   ;;  %s1260_s7 = inlined_call_operand.vmem [shape: f32[1,32], index: 7, kind: input, shape index: {}]   ;;  %s1261_s8 = inlined_call_operand.vmem [shape: f32[1,32], index: 8, kind: input, shape index: {}]   ;;  %s1262_s9 = inlined_call_operand.hbm [shape: f32[2,8,32], index: 9, kind: output, shape index: {}]  }
   0x1   :  { %16 = vsyncpa [#allocation3 + $0x1], 0  ;;  %s1094_s28 = smov 0   ;;  %s1096_s29 = smov 0  }
   0x2   :  { %s1098_s30 = smov 0   ;;  %s1100_s10 = smov 0  }
   0x3   :  { %s1102_s11 = smov 0   ;;  %s1104_s12 = smov 0  }
   0x4 LB: > { %s835_s13 = sadd.s32 4294967295, %s1036_s12   ;;  %s836_s14 = sadd.s32 4294967294, %s1036_s12   ;;  %s1036_s12 = sphi %s1104_s12, %s22_s12   ;;  %s1032_s11 = sphi %s1102_s11, %s1269_s11   ;;  %s1028_s10 = sphi %s1100_s10, %s1268_s10   ;;  %s1024_s30 = sphi %s1098_s30, %s1267_s30   ;;  %s1020_s29 = sphi %s1096_s29, %s1266_s29   ;;  %s1016_s28 = sphi %s1094_s28, %s1265_s28  }
   0x5   : > { %s34_s15 = sadd.s32 1, %s1032_s11  ;;  %s279_s16 = sadd.s32 1, %s1024_s30 }
   0x6   : > { %p36_p0 = scmp.ge.s32.totalorder %s34_s15, 2  ;;  %p289_p1 = scmp.ne.s32.totalorder %s1024_s30, %s1020_s29 }
   0x7   : > { %p290_p2 = scmp.eq.s32.totalorder %s835_s13, 1  ;;  %p295_p3 = scmp.ne.s32.totalorder %s1020_s29, %s1016_s28 }
   0x8   : > { %s1271_s15 = smov (%p36_p0, %s34_s15), 0  ;;  %p296_p5 = scmp.eq.s32.totalorder %s836_s14, 1 }
   0x9   : > { %p1134_p4 = por %p290_p2, %p289_p1  ;;  %s274_s18 = ssub.s32 %s1032_s11, %s1271_s15 }
   0xa   : > { %p839_p6 = scmp.ge.s32.totalorder %s1036_s12, 1  ;;  %p277_p7 = scmp.eq.s32.totalorder %s274_s18, 0 }
   0xb   : > { %p1141_p8 = por %p296_p5, %p295_p3  ;;  %p388_p9 = scmp.lt.s32.totalorder %s1036_s12, 3 }
   0xc   : > { %s1147_s20 = scalar_select %p277_p7, %s1024_s30, %s279_s16  }
   0xd   : > { %p389_p10 = pnand %p839_p6, %p388_p9 }
   0xe   : > { %p460_p11 = scmp.lt.s32.totalorder (!%p389_p10), %s1028_s10, 1  ;;  %s1041_s24 = smov (!%p389_p10), 32  }
   0xf   : > { %392 = sbr.rel (%p389_p10) target bundleno = 540 (0x21c), region = 56  ;;  %s1042_s13 = smov (!%p389_p10), 64  }
  0x10   : > { %s851_s2 = sshll.u32 (!%p389_p10), %s1028_s10, 7 }
  0x11   : > { %s702_s21 = scalar_lea.hbm (!%p389_p10), %s1262_s9, %s851_s2 }
  0x14   : > { %v520_v0 = vlaneseq  ;;  %v563_v1 = vld [vmem:[%s1258_s5 + $0x58] sm:$0xff]  ;;  %v1038_v2 = vmov 0.0   ;;  %v562_v3 = vld [vmem:[%s1258_s5 + $0x50] sm:$0xff]  ;;  %s461_s25 = scalar_select %p460_p11, %s1028_s10, 1  ;;  %v561_v5 = vld [vmem:[%s1258_s5 + $0x48] sm:$0xff]  ;;  %vm1039_vm0 = vmmov 0  }
  0x15   : > { %867 = vmatprep.subr.mxu0 %v1038_v2  ;;  %891 = vmatprep.mubr.msk.f32.mxu0 %vm1039_vm0, %v1038_v2  ;;  %v1040_v7 = vmov 0   ;;  %v560_v8 = vld [vmem:[%s1258_s5 + $0x40] sm:$0xff]  ;;  %v559_v14 = vld [vmem:[%s1258_s5 + $0x38] sm:$0xff]  ;;  %v558_v16 = vld [vmem:[%s1258_s5 + $0x30] sm:$0xff]  ;;  %vm548_vm3 = vcmask 261120   ;;  %vm550_vm4 = vcmask 523264  }
  0x16   : > { %v521_v4 = vshrl.u32 %v520_v0, 7  ;;  %868 = vmatpush3.msra.mxu0 %v563_v1  ;;  %s1160_s27 = sshll.u32 %s461_s25, 3  ;;  %954 = vset.pattern.permute.xlu1 %v1040_v7  ;;  %v557_v18 = vld [vmem:[%s1258_s5 + $0x28] sm:$0xff]  ;;  %v556_v19 = vld [vmem:[%s1258_s5 + $0x20] sm:$0xff]  ;;  %v555_v20 = vld [vmem:[%s1258_s5 + $0x18] sm:$0xff]  ;;  %vm571_vm5 = vcmask 785408  }
  0x17   : > { %869 = vmatprep.subr.mxu0 %v1038_v2  ;;  %s466_s14 = scalar_lea.vmem %s1253_s0, %s1160_s27  ;;  %s506_s23 = scalar_lea.vmem %s1257_s4, %s1160_s27  ;;  %955 = vset.pattern.permute.xlu0 %v1040_v7  ;;  %v554_v21 = vld [vmem:[%s1258_s5 + $0x10] sm:$0xff]  ;;  %v553_v22 = vld [vmem:[%s1258_s5 + $0x8] sm:$0xff]  ;;  %v552_v23 = vld [vmem:[%s1258_s5] sm:$0xff] }
  0x18   : > { %v528_v6 = vsub.s32 0, %v521_v4  ;;  %870 = vmatpush3.msra.mxu0 %v562_v3  ;;  %v507_v9 = vld [vmem:[%s466_s14] sm:$0xff]  ;;  %vm531_vm1 = vcmp.eq.s32.totalorder %v521_v4, 7  ;;  %vm522_vm2 = vcmp.eq.s32.totalorder %v521_v4, 0  ;;  %s499_s22 = scalar_lea.vmem %s1256_s3, %s1160_s27  ;;  %s457_s27 = sand.u32 1, %s1020_s29  }
  0x19   : > { %871 = vmatprep.subr.mxu0 %v1038_v2  ;;  %v645_v11 = vld [vmem:[%s506_s23] sm:$0xff]  ;;  %541 = vrot.lane.b32.xlu0 %v507_v9, %s1041_s24  ;;  %v523_v12 = vrot.slane %v507_v9, 7  ;;  %v532_v13 = vrot.slane %v507_v9, 1  ;;  %s840_s23 = sshll.u32 %s457_s27, 3  ;;  %s1043_s25 = smov [#allocation2]  }
  0x1a   : > { %v529_v10 = vrot.slane %v1038_v2, %v528_v6  ;;  %872 = vmatpush3.msra.mxu0 %v561_v5  ;;  %648 = vperm.xlu1 %954, %v645_v11   ;;  %v846_v28 = vld [vmem:[%s1259_s6] ss:$0 sm:$0xff]  ;;  %s964_s26 = sshll.u32 %s1043_s25, 4  ;;  %s965_s26 = int_to_ptr.vmem [resolvable:$false] %s964_s26 }
  0x1b   : > { %873 = vmatprep.subr.mxu0 %v1038_v2  ;;  %v653_v34 = vld [vmem:[%s499_s22] sm:$0xff]  ;;  %s690_s22 = scalar_lea.sflag [#allocation3], %s457_s27  ;;  %s966_s10 = scalar_lea.vmem %s965_s26, 256 }
  0x1c   : > { %874 = vmatpush3.msra.mxu0 %v560_v8  ;;  %v539_v15 = vsel %vm531_vm1, %v529_v10, %v532_v13  ;;  %v530_v17 = vsel %vm522_vm2, %v529_v10, %v523_v12  ;;  %v848_v49 = vld [vmem:[%s1260_s7] ss:$0 sm:$0xff] }
  0x1d   : > { %875 = vmatprep.subr.mxu0 %v1038_v2  ;;  %545 = vrot.lane.b32.xlu0 %v539_v15, %s1042_s13  ;;  %v849_v51 = vld [vmem:[%s1261_s8] ss:$0 sm:$0xff]  ;;  %s459_s13 = scalar_lea.vmem [#allocation2], %s840_s23 }
  0x1e   : > { %876 = vmatpush3.msra.mxu0 %v559_v14  ;;  %s704_s14 = sshll.u32 %s459_s13, 4  ;;  %s705_s14 = int_to_ptr.vmem [resolvable:$true] %s704_s14 }
  0x1f   : > { %877 = vmatprep.subr.mxu0 %v1038_v2  ;;  %s960_s24 = scalar_lea.vmem %s705_s14, 128  ;;  %p967_p1 = scmp.lt.s32.totalorder %s705_s14, %s965_s26 }
  0x20   : > { %878 = vmatpush3.msra.mxu0 %v558_v16  ;;  %p961_p12 = scmp.ne.s32.totalorder %s705_s14, %s960_s24  ;;  %p968_p2 = scmp.lt.s32.totalorder %s966_s10, %s960_s24 }
  0x21   : > { %879 = vmatprep.subr.mxu0 %v1038_v2 }
  0x22   : > { %880 = vmatpush3.msra.mxu0 %v557_v18  ;;  %p962_p13 = pnand %p961_p12, %p1134_p4  ;;  %p969_p3 = por %p968_p2, %p967_p1 }
  0x23   : > { %881 = vmatprep.subr.mxu0 %v1038_v2 }
  0x24   : > { %882 = vmatpush3.msra.mxu0 %v556_v19  ;;  %p963_p0 = pneg %p962_p13 }
  0x25   : > { %883 = vmatprep.subr.mxu0 %v1038_v2 }
  0x26   : > { %884 = vmatpush3.msra.mxu0 %v555_v20  ;;  %p970_p5 = pnand %p969_p3, %p963_p0 }
  0x27   : > { %885 = vmatprep.subr.mxu0 %v1038_v2 }
  0x28   : > { %886 = vmatpush3.msra.mxu0 %v554_v21 }
  0x29   : > { %887 = vmatprep.subr.mxu0 %v1038_v2 }
  0x2a   : > { %888 = vmatpush3.msra.mxu0 %v553_v22 }
  0x2b   : > { %889 = vmatprep.subr.mxu0 %v1038_v2 }
  0x2c   : > { %890 = vmatpush3.msra.mxu0 %v552_v23 }
  0x8b   : > { %v542_v24 = vpop.permute.xlu0 %541 }
  0x8c   : > { %v549_v25 = vsel %vm548_vm3, %v530_v17, %v542_v24 }
  0x8f   : > { %v546_v26 = vpop.permute.xlu0 %545 }
  0x90   : > { %v551_v27 = vsel %vm550_vm4, %v549_v25, %v546_v26 }
  0x91   : > { %892 = vmatmul.mubr.msk.f32.vlgmr.msra.gmra.mxu0 %vm571_vm5, %v551_v27 }
  0x95   : > { %v649_v30 = vpop.permute.xlu1 %648 }
 0x151   : > { %v641_v29 = vpop.f32.mrf.mxu0 }
 0x152   : > { %v642_v31 = vadd.f32 %v846_v28, %v641_v29 }
 0x153   : > { %v893_v32 = vpop.f32.mrf.mxu0 }
 0x154   : > { %v651_v33 = vmul.f32 %v649_v30, %v642_v31 }
 0x156   : > { %956 = vtanh.f32 %v651_v33 }
 0x163   : > { %v957_v35 = vpop.eup %956 }
 0x164   : > { %v654_v36 = vadd.f32 %v957_v35, %v653_v34 }
 0x166   : > { %v655_v37 = vsel %vm548_vm3, %v654_v36, 0.0  ;;  %v660_v38 = vmul.f32 %v654_v36, %v654_v36 }
 0x167   : > { %656 = vadd.xlane.f32.xlu1 %v655_v37 }
 0x168   : > { %v661_v39 = vsel %vm548_vm3, %v660_v38, 0.0 }
 0x169   : > { %662 = vadd.xlane.f32.xlu0 %v661_v39 }
 0x1f0   : > { %v657_v40 = vpop.xlane.xlu1 %656 }
 0x1f1   : > { %v659_v41 = vmul.f32 0.03125, %v657_v40 }
 0x1f2   : > { %v663_v42 = vpop.xlane.xlu0 %662 }
 0x1f3   : > { %v665_v43 = vmul.f32 %v659_v41, %v659_v41  ;;  %v664_v44 = vmul.f32 0.03125, %v663_v42  ;;  %v667_v47 = vsub.f32 %v654_v36, %v659_v41 }
 0x1f5   : > { %v666_v45 = vsub.f32 %v664_v44, %v665_v43 }
 0x1f7   : > { %v668_v46 = vadd.f32 1e-07, %v666_v45 }
 0x1f9   : > { %958 = vrsqrt.f32 %v668_v46 }
 0x206   : > { %v959_v48 = vpop.eup %958 }
 0x207   : > { %v670_v50 = vmul.f32 %v959_v48, %v667_v47 }
 0x209   : > { %v678_v52 = vmul.f32 %v848_v49, %v670_v50 }
 0x20b   : > { %v686_v53 = vadd.f32 %v849_v51, %v678_v52 }
 0x20d   : > { %v687_v54 = vmul.f32 %v686_v53, %v649_v30 }
 0x20f   : > { %688 = vst.msk [vmem:[%s459_s13] sm:$0xff] %vm548_vm3, %v687_v54 }
 0x210   : > { %973 = shalt.err (!%p970_p5)
}
 0x211   : > { %s974_s23 = scalar_lea.hbm %s702_s21, 128  ;;  %s978_s2 = scalar_lea.hbm %s1262_s9, 256 }
 0x212   : > { %p975_p6 = scmp.ne.s32.totalorder %s702_s21, %s974_s23  ;;  %p979_p10 = scmp.lt.s32.totalorder %s702_s21, %s1262_s9 }
 0x213   : > { %p980_p11 = scmp.lt.s32.totalorder %s978_s2, %s974_s23 }
 0x214   : > { %p976_p7 = pnand %p975_p6, %p1134_p4 }
 0x215   : > { %p981_p12 = por %p980_p11, %p979_p10 }
 0x216   : > { %p977_p9 = pneg %p976_p7 }
 0x218   : > { %p982_p13 = pnand %p981_p12, %p977_p9 }
 0x21a   : > { %985 = shalt.err (!%p982_p13)
}
 0x21b   : > { %894 = dma.vmem_to_hbm [thread:$0]  (%p1134_p4), %s705_s14, 128, %s702_s21, %s690_s22  }
 0x21c PF: > { %p900_p0 = scmp.ge.s32.totalorder %s1036_s12, 2  ;;  %s716_s18 = sand.u32 1, %s1016_s28  }
 0x21d   : > { %s717_s24 = scalar_lea.sflag [#allocation3], %s716_s18 }
 0x21e   : > { %p897_p1 = pnand %p900_p0, %p1141_p8 }
 0x220   : > { %p898_p2 = pneg %p897_p1 }
 0x222   : > { %1011 = dma.done.wait (%p898_p2), %s717_s24, 128  }
 0x223   : > { %1013 = vsyncadd (%p898_p2), %s717_s24, 4294967168  ;;  %s22_s12 = sadd.s32 1, %s1036_s12   ;;  %s1265_s28 = smov %s1020_s29 }
 0x224   : > { %p19_p3 = scmp.ge.s32.totalorder %s22_s12, 4   ;;  %s1266_s29 = smov %s1024_s30 }
 0x225   : > { %s1267_s30 = smov %s1147_s20  ;;  %s1268_s10 = smov %s1032_s11 }
 0x226   : > { %s1269_s11 = smov %s1271_s15  ;;  %21 = sbr.rel (!%p19_p3) target bundleno = 4 (0x4), region = 103 }
 0x22b   :  { %722 = vsyncpa [#allocation3], 1 }
 0x22c   :  { %724 = vsyncpa [#allocation3 + $0x1], 1 }

// kernel: tpu_custom_call.1
= control target key start
LH: loop header
LB: loop body
LE: loop exit
PB: predicated region body
PF: predicated region fallthrough
CT: control target
= control target key end

     0   :  { %14 = vsyncpa [#allocation3], 0  ;;  %s1253_s0 = inlined_call_operand.vmem [shape: f32[2,8,32], index: 0, kind: input, shape index: {}]   ;;  %s1254_s1 = inlined_call_operand.vmem [shape: f32[2,8,32], index: 1, kind: input, shape index: {}]   ;;  %s1255_s2 = inlined_call_operand.vmem [shape: f32[2,8,32], index: 2, kind: input, shape index: {}]   ;;  %s1256_s3 = inlined_call_operand.vmem [shape: f32[2,8,32], index: 3, kind: input, shape index: {}]   ;;  %s1257_s4 = inlined_call_operand.vmem [shape: f32[2,8,1], index: 4, kind: input, shape index: {}]   ;;  %s1258_s5 = inlined_call_operand.vmem [shape: f32[96,32], index: 5, kind: input, shape index: {}]   ;;  %s1259_s6 = inlined_call_operand.vmem [shape: f32[1,32], index: 6, kind: input, shape index: {}]   ;;  %s1260_s7 = inlined_call_operand.vmem [shape: f32[1,32], index: 7, kind: input, shape index: {}]   ;;  %s1261_s8 = inlined_call_operand.vmem [shape: f32[1,32], index: 8, kind: input, shape index: {}]   ;;  %s1262_s9 = inlined_call_operand.hbm [shape: f32[2,8,32], index: 9, kind: output, shape index: {}]  }
   0x1   :  { %16 = vsyncpa [#allocation3 + $0x1], 0  ;;  %s1094_s28 = smov 0   ;;  %s1096_s29 = smov 0  }
   0x2   :  { %s1098_s30 = smov 0   ;;  %s1100_s10 = smov 0  }
   0x3   :  { %s1102_s11 = smov 0   ;;  %s1104_s12 = smov 0  }
   0x4 LB: > { %s835_s13 = sadd.s32 4294967295, %s1036_s12   ;;  %s836_s14 = sadd.s32 4294967294, %s1036_s12   ;;  %s1036_s12 = sphi %s1104_s12, %s22_s12   ;;  %s1032_s11 = sphi %s1102_s11, %s1269_s11   ;;  %s1028_s10 = sphi %s1100_s10, %s1268_s10   ;;  %s1024_s30 = sphi %s1098_s30, %s1267_s30   ;;  %s1020_s29 = sphi %s1096_s29, %s1266_s29   ;;  %s1016_s28 = sphi %s1094_s28, %s1265_s28  }
   0x5   : > { %s34_s15 = sadd.s32 1, %s1032_s11  ;;  %s279_s16 = sadd.s32 1, %s1024_s30 }
   0x6   : > { %p36_p0 = scmp.ge.s32.totalorder %s34_s15, 2  ;;  %p289_p1 = scmp.ne.s32.totalorder %s1024_s30, %s1020_s29 }
   0x7   : > { %p290_p2 = scmp.eq.s32.totalorder %s835_s13, 1  ;;  %p295_p3 = scmp.ne.s32.totalorder %s1020_s29, %s1016_s28 }
   0x8   : > { %s1271_s15 = smov (%p36_p0, %s34_s15), 0  ;;  %p296_p5 = scmp.eq.s32.totalorder %s836_s14, 1 }
   0x9   : > { %p1134_p4 = por %p290_p2, %p289_p1  ;;  %s274_s18 = ssub.s32 %s1032_s11, %s1271_s15 }
   0xa   : > { %p839_p6 = scmp.ge.s32.totalorder %s1036_s12, 1  ;;  %p277_p7 = scmp.eq.s32.totalorder %s274_s18, 0 }
   0xb   : > { %p1141_p8 = por %p296_p5, %p295_p3  ;;  %p388_p9 = scmp.lt.s32.totalorder %s1036_s12, 3 }
   0xc   : > { %s1147_s20 = scalar_select %p277_p7, %s1024_s30, %s279_s16  }
   0xd   : > { %p389_p10 = pnand %p839_p6, %p388_p9 }
   0xe   : > { %p460_p11 = scmp.lt.s32.totalorder (!%p389_p10), %s1028_s10, 1  ;;  %s1041_s24 = smov (!%p389_p10), 32  }
   0xf   : > { %392 = sbr.rel (%p389_p10) target bundleno = 540 (0x21c), region = 56  ;;  %s1042_s13 = smov (!%p389_p10), 64  }
  0x10   : > { %s851_s2 = sshll.u32 (!%p389_p10), %s1028_s10, 7 }
  0x11   : > { %s702_s21 = scalar_lea.hbm (!%p389_p10), %s1262_s9, %s851_s2 }
  0x14   : > { %v520_v0 = vlaneseq  ;;  %v563_v1 = vld [vmem:[%s1258_s5 + $0x58] sm:$0xff]  ;;  %v1038_v2 = vmov 0.0   ;;  %v562_v3 = vld [vmem:[%s1258_s5 + $0x50] sm:$0xff]  ;;  %s461_s25 = scalar_select %p460_p11, %s1028_s10, 1  ;;  %v561_v5 = vld [vmem:[%s1258_s5 + $0x48] sm:$0xff]  ;;  %vm1039_vm0 = vmmov 0  }
  0x15   : > { %867 = vmatprep.subr.mxu0 %v1038_v2  ;;  %891 = vmatprep.mubr.msk.f32.mxu0 %vm1039_vm0, %v1038_v2  ;;  %v1040_v7 = vmov 0   ;;  %v560_v8 = vld [vmem:[%s1258_s5 + $0x40] sm:$0xff]  ;;  %v559_v14 = vld [vmem:[%s1258_s5 + $0x38] sm:$0xff]  ;;  %v558_v16 = vld [vmem:[%s1258_s5 + $0x30] sm:$0xff]  ;;  %vm548_vm3 = vcmask 261120   ;;  %vm550_vm4 = vcmask 523264  }
  0x16   : > { %v521_v4 = vshrl.u32 %v520_v0, 7  ;;  %868 = vmatpush3.msra.mxu0 %v563_v1  ;;  %s1160_s27 = sshll.u32 %s461_s25, 3  ;;  %954 = vset.pattern.permute.xlu1 %v1040_v7  ;;  %v557_v18 = vld [vmem:[%s1258_s5 + $0x28] sm:$0xff]  ;;  %v556_v19 = vld [vmem:[%s1258_s5 + $0x20] sm:$0xff]  ;;  %v555_v20 = vld [vmem:[%s1258_s5 + $0x18] sm:$0xff]  ;;  %vm571_vm5 = vcmask 785408  }
  0x17   : > { %869 = vmatprep.subr.mxu0 %v1038_v2  ;;  %s466_s14 = scalar_lea.vmem %s1253_s0, %s1160_s27  ;;  %s506_s23 = scalar_lea.vmem %s1257_s4, %s1160_s27  ;;  %955 = vset.pattern.permute.xlu0 %v1040_v7  ;;  %v554_v21 = vld [vmem:[%s1258_s5 + $0x10] sm:$0xff]  ;;  %v553_v22 = vld [vmem:[%s1258_s5 + $0x8] sm:$0xff]  ;;  %v552_v23 = vld [vmem:[%s1258_s5] sm:$0xff] }
  0x18   : > { %v528_v6 = vsub.s32 0, %v521_v4  ;;  %870 = vmatpush3.msra.mxu0 %v562_v3  ;;  %v507_v9 = vld [vmem:[%s466_s14] sm:$0xff]  ;;  %vm531_vm1 = vcmp.eq.s32.totalorder %v521_v4, 7  ;;  %vm522_vm2 = vcmp.eq.s32.totalorder %v521_v4, 0  ;;  %s499_s22 = scalar_lea.vmem %s1256_s3, %s1160_s27  ;;  %s457_s27 = sand.u32 1, %s1020_s29  }
  0x19   : > { %871 = vmatprep.subr.mxu0 %v1038_v2  ;;  %v645_v11 = vld [vmem:[%s506_s23] sm:$0xff]  ;;  %541 = vrot.lane.b32.xlu0 %v507_v9, %s1041_s24  ;;  %v523_v12 = vrot.slane %v507_v9, 7  ;;  %v532_v13 = vrot.slane %v507_v9, 1  ;;  %s840_s23 = sshll.u32 %s457_s27, 3  ;;  %s1043_s25 = smov [#allocation2]  }
  0x1a   : > { %v529_v10 = vrot.slane %v1038_v2, %v528_v6  ;;  %872 = vmatpush3.msra.mxu0 %v561_v5  ;;  %648 = vperm.xlu1 %954, %v645_v11   ;;  %v846_v28 = vld [vmem:[%s1259_s6] ss:$0 sm:$0xff]  ;;  %s964_s26 = sshll.u32 %s1043_s25, 4  ;;  %s965_s26 = int_to_ptr.vmem [resolvable:$false] %s964_s26 }
  0x1b   : > { %873 = vmatprep.subr.mxu0 %v1038_v2  ;;  %v653_v34 = vld [vmem:[%s499_s22] sm:$0xff]  ;;  %s690_s22 = scalar_lea.sflag [#allocation3], %s457_s27  ;;  %s966_s10 = scalar_lea.vmem %s965_s26, 256 }
  0x1c   : > { %874 = vmatpush3.msra.mxu0 %v560_v8  ;;  %v539_v15 = vsel %vm531_vm1, %v529_v10, %v532_v13  ;;  %v530_v17 = vsel %vm522_vm2, %v529_v10, %v523_v12  ;;  %v848_v49 = vld [vmem:[%s1260_s7] ss:$0 sm:$0xff] }
  0x1d   : > { %875 = vmatprep.subr.mxu0 %v1038_v2  ;;  %545 = vrot.lane.b32.xlu0 %v539_v15, %s1042_s13  ;;  %v849_v51 = vld [vmem:[%s1261_s8] ss:$0 sm:$0xff]  ;;  %s459_s13 = scalar_lea.vmem [#allocation2], %s840_s23 }
  0x1e   : > { %876 = vmatpush3.msra.mxu0 %v559_v14  ;;  %s704_s14 = sshll.u32 %s459_s13, 4  ;;  %s705_s14 = int_to_ptr.vmem [resolvable:$true] %s704_s14 }
  0x1f   : > { %877 = vmatprep.subr.mxu0 %v1038_v2  ;;  %s960_s24 = scalar_lea.vmem %s705_s14, 128  ;;  %p967_p1 = scmp.lt.s32.totalorder %s705_s14, %s965_s26 }
  0x20   : > { %878 = vmatpush3.msra.mxu0 %v558_v16  ;;  %p961_p12 = scmp.ne.s32.totalorder %s705_s14, %s960_s24  ;;  %p968_p2 = scmp.lt.s32.totalorder %s966_s10, %s960_s24 }
  0x21   : > { %879 = vmatprep.subr.mxu0 %v1038_v2 }
  0x22   : > { %880 = vmatpush3.msra.mxu0 %v557_v18  ;;  %p962_p13 = pnand %p961_p12, %p1134_p4  ;;  %p969_p3 = por %p968_p2, %p967_p1 }
  0x23   : > { %881 = vmatprep.subr.mxu0 %v1038_v2 }
  0x24   : > { %882 = vmatpush3.msra.mxu0 %v556_v19  ;;  %p963_p0 = pneg %p962_p13 }
  0x25   : > { %883 = vmatprep.subr.mxu0 %v1038_v2 }
  0x26   : > { %884 = vmatpush3.msra.mxu0 %v555_v20  ;;  %p970_p5 = pnand %p969_p3, %p963_p0 }
  0x27   : > { %885 = vmatprep.subr.mxu0 %v1038_v2 }
  0x28   : > { %886 = vmatpush3.msra.mxu0 %v554_v21 }
  0x29   : > { %887 = vmatprep.subr.mxu0 %v1038_v2 }
  0x2a   : > { %888 = vmatpush3.msra.mxu0 %v553_v22 }
  0x2b   : > { %889 = vmatprep.subr.mxu0 %v1038_v2 }
  0x2c   : > { %890 = vmatpush3.msra.mxu0 %v552_v23 }
  0x8b   : > { %v542_v24 = vpop.permute.xlu0 %541 }
  0x8c   : > { %v549_v25 = vsel %vm548_vm3, %v530_v17, %v542_v24 }
  0x8f   : > { %v546_v26 = vpop.permute.xlu0 %545 }
  0x90   : > { %v551_v27 = vsel %vm550_vm4, %v549_v25, %v546_v26 }
  0x91   : > { %892 = vmatmul.mubr.msk.f32.vlgmr.msra.gmra.mxu0 %vm571_vm5, %v551_v27 }
  0x95   : > { %v649_v30 = vpop.permute.xlu1 %648 }
 0x151   : > { %v641_v29 = vpop.f32.mrf.mxu0 }
 0x152   : > { %v642_v31 = vadd.f32 %v846_v28, %v641_v29 }
 0x153   : > { %v893_v32 = vpop.f32.mrf.mxu0 }
 0x154   : > { %v651_v33 = vmul.f32 %v649_v30, %v642_v31 }
 0x156   : > { %956 = vtanh.f32 %v651_v33 }
 0x163   : > { %v957_v35 = vpop.eup %956 }
 0x164   : > { %v654_v36 = vadd.f32 %v957_v35, %v653_v34 }
 0x166   : > { %v655_v37 = vsel %vm548_vm3, %v654_v36, 0.0  ;;  %v660_v38 = vmul.f32 %v654_v36, %v654_v36 }
 0x167   : > { %656 = vadd.xlane.f32.xlu1 %v655_v37 }
 0x168   : > { %v661_v39 = vsel %vm548_vm3, %v660_v38, 0.0 }
 0x169   : > { %662 = vadd.xlane.f32.xlu0 %v661_v39 }
 0x1f0   : > { %v657_v40 = vpop.xlane.xlu1 %656 }
 0x1f1   : > { %v659_v41 = vmul.f32 0.03125, %v657_v40 }
 0x1f2   : > { %v663_v42 = vpop.xlane.xlu0 %662 }
 0x1f3   : > { %v665_v43 = vmul.f32 %v659_v41, %v659_v41  ;;  %v664_v44 = vmul.f32 0.03125, %v663_v42  ;;  %v667_v47 = vsub.f32 %v654_v36, %v659_v41 }
 0x1f5   : > { %v666_v45 = vsub.f32 %v664_v44, %v665_v43 }
 0x1f7   : > { %v668_v46 = vadd.f32 1e-07, %v666_v45 }
 0x1f9   : > { %958 = vrsqrt.f32 %v668_v46 }
 0x206   : > { %v959_v48 = vpop.eup %958 }
 0x207   : > { %v670_v50 = vmul.f32 %v959_v48, %v667_v47 }
 0x209   : > { %v678_v52 = vmul.f32 %v848_v49, %v670_v50 }
 0x20b   : > { %v686_v53 = vadd.f32 %v849_v51, %v678_v52 }
 0x20d   : > { %v687_v54 = vmul.f32 %v686_v53, %v649_v30 }
 0x20f   : > { %688 = vst.msk [vmem:[%s459_s13] sm:$0xff] %vm548_vm3, %v687_v54 }
 0x210   : > { %973 = shalt.err (!%p970_p5)
}
 0x211   : > { %s974_s23 = scalar_lea.hbm %s702_s21, 128  ;;  %s978_s2 = scalar_lea.hbm %s1262_s9, 256 }
 0x212   : > { %p975_p6 = scmp.ne.s32.totalorder %s702_s21, %s974_s23  ;;  %p979_p10 = scmp.lt.s32.totalorder %s702_s21, %s1262_s9 }
 0x213   : > { %p980_p11 = scmp.lt.s32.totalorder %s978_s2, %s974_s23 }
 0x214   : > { %p976_p7 = pnand %p975_p6, %p1134_p4 }
 0x215   : > { %p981_p12 = por %p980_p11, %p979_p10 }
 0x216   : > { %p977_p9 = pneg %p976_p7 }
 0x218   : > { %p982_p13 = pnand %p981_p12, %p977_p9 }
 0x21a   : > { %985 = shalt.err (!%p982_p13)
}
 0x21b   : > { %894 = dma.vmem_to_hbm [thread:$0]  (%p1134_p4), %s705_s14, 128, %s702_s21, %s690_s22  }
 0x21c PF: > { %p900_p0 = scmp.ge.s32.totalorder %s1036_s12, 2  ;;  %s716_s18 = sand.u32 1, %s1016_s28  }
 0x21d   : > { %s717_s24 = scalar_lea.sflag [#allocation3], %s716_s18 }
 0x21e   : > { %p897_p1 = pnand %p900_p0, %p1141_p8 }
 0x220   : > { %p898_p2 = pneg %p897_p1 }
 0x222   : > { %1011 = dma.done.wait (%p898_p2), %s717_s24, 128  }
 0x223   : > { %1013 = vsyncadd (%p898_p2), %s717_s24, 4294967168  ;;  %s22_s12 = sadd.s32 1, %s1036_s12   ;;  %s1265_s28 = smov %s1020_s29 }
 0x224   : > { %p19_p3 = scmp.ge.s32.totalorder %s22_s12, 4   ;;  %s1266_s29 = smov %s1024_s30 }
 0x225   : > { %s1267_s30 = smov %s1147_s20  ;;  %s1268_s10 = smov %s1032_s11 }
 0x226   : > { %s1269_s11 = smov %s1271_s15  ;;  %21 = sbr.rel (!%p19_p3) target bundleno = 4 (0x4), region = 103 }
 0x22b   :  { %722 = vsyncpa [#allocation3], 1 }
 0x22c   :  { %724 = vsyncpa [#allocation3 + $0x1], 1 }

</bundles_post_ra>
